<compile_context>
chip_gen: v7x
topology: tpu7x:2x2x1
jax: 0.10.0
libtpu: 0.0.40
codegen_flags: <defaults>
</compile_context>

<pallas_src>
import functools

import jax
import jax.numpy as jnp
from jax.experimental import pallas as pl
from jax.experimental.pallas import tpu as pltpu


def _round_up(x, m):
    return ((x + m - 1) // m) * m


def _largest_divisor_leq(n, cap):
    n = int(n)
    cap = max(1, min(int(cap), n))
    for d in range(cap, 0, -1):
        if n % d == 0:
            return d
    return 1


def _physical_vmem_bytes():
    try:
        info = pltpu.get_tpu_info()
        v = int(getattr(info, "vmem_capacity_bytes", 0))
        if v > 0:
            return v
    except Exception:
        pass
    return 64 << 20  # conservative fallback == v7x per-TensorCore VMEM


def _lowrank_kernel(x_ref, u_ref, v_ref, b_ref, o_ref, h_ref, *, activation):
    # x: (tile_b, input_size)  [compute dtype]
    # u: (input_size, r_pad)   [compute dtype]  (already U @ S, rank zero-padded)
    # v: (r_pad, tile_n)       [compute dtype]  (already V.T, lane-dense)
    # b: (1, tile_n)           [f32]
    # o: (tile_b, tile_n)      [out dtype]
    # h: (tile_b, r_pad)       [f32 VMEM scratch, carried across the j axis]
    @pl.when(pl.program_id(1) == 0)
    def _():
        h_ref[...] = jnp.dot(x_ref[...], u_ref[...],
                             preferred_element_type=jnp.float32)

    h = h_ref[...]
    y = jnp.dot(h.astype(v_ref.dtype), v_ref[...],
                preferred_element_type=jnp.float32)
    y = y + b_ref[...]                       # broadcast (1, tile_n) over rows
    if activation is not None:
        y = activation(y)
    o_ref[...] = y.astype(o_ref.dtype)


def vanilla_low_rank_forward(x, U, S, V, bias, activation=None, *,
                             tile_b=256, tile_n=512, max_tile_n=None,
                             compute_dtype=None, out_dtype=None,
                             vmem_limit_bytes=None,
                             single_buffer_weights=True):
    """Pallas implementation of VanillaLowRankLayer.forward.

    y = activation(((x @ U) @ S) @ V.T + bias)

    x: (B, input_size), U: (input_size, rank), S: (rank, rank),
    V: (output_size, rank), bias: (output_size,)
    """
    B, input_size = x.shape
    rank = U.shape[1]
    output_size = V.shape[0]
    assert U.shape == (input_size, rank)
    assert S.shape == (rank, rank)
    assert V.shape == (output_size, rank)
    assert bias.shape == (output_size,)

    if out_dtype is None:
        out_dtype = x.dtype
    if compute_dtype is None:
        # HBM-bound kernel: stream bf16 by default for f32 inputs.
        compute_dtype = jnp.bfloat16 if jnp.dtype(x.dtype) == jnp.float32 else x.dtype
    compute_dtype = jnp.dtype(compute_dtype)
    csize = compute_dtype.itemsize
    osize = jnp.dtype(out_dtype).itemsize

    # --- Wrapper-side algebra / layout plumbing (amortized over the batch) ---
    Ueff = jnp.dot(U.astype(jnp.float32), S.astype(jnp.float32))  # fold S into U
    Vt = jnp.transpose(V)                                         # (rank, output_size)

    # Zero-pad rank to a lane-dense multiple of 128 (keeps h and MXU feeds dense).
    r_pad = _round_up(rank, 128)
    if r_pad != rank:
        Ueff = jnp.pad(Ueff, ((0, 0), (0, r_pad - rank)))
        Vt = jnp.pad(Vt, ((0, r_pad - rank), (0, 0)))

    # --- Tile sizing (divisor-aware, VMEM-budgeted) -------------------------
    min_b = 8 * max(1, 4 // csize)               # f32 -> 8, bf16 -> 16
    B_pad = _round_up(B, min_b)
    b_units = B_pad // min_b
    N_pad = _round_up(output_size, 128)
    n_units = N_pad // 128

    physical_vmem = _physical_vmem_bytes()
    budget = int(0.70 * physical_vmem)

    def _footprint(tb, tn):
        # Pessimistic: everything double-buffered, plus the f32 h scratch.
        return (2 * (tb * input_size * csize        # x tile
                     + input_size * r_pad * csize   # U@S
                     + r_pad * tn * csize           # V.T tile
                     + tn * 4                       # bias tile
                     + tb * tn * osize)             # out tile
                + tb * r_pad * 4)                   # h scratch

    # Batch tile: largest divisor of b_units not exceeding the target, with a
    # preference for >= 2 batch tiles so the "parallel" axis feeds both v7x TCs.
    tb_units = _largest_divisor_leq(b_units, max(1, int(tile_b) // min_b))
    if b_units >= 2 and tb_units == b_units:
        tb_units = _largest_divisor_leq(b_units, max(1, b_units // 2))
    tile_b_sel = tb_units * min_b

    # Output tile: prefer the full padded output (1-D-over-batch behaviour);
    # fall back to a divisor-aware narrower tile only if VMEM doesn't allow it.
    tn_cap_units = n_units
    if max_tile_n is not None:
        tn_cap_units = max(1, min(n_units, int(max_tile_n) // 128))
    tn_units = _largest_divisor_leq(n_units, tn_cap_units)
    tile_n_sel = tn_units * 128
    if _footprint(tile_b_sel, tile_n_sel) > budget:
        tn_units = _largest_divisor_leq(
            n_units, min(tn_cap_units, max(1, int(tile_n) // 128)))
        tile_n_sel = tn_units * 128
        # Still over budget -> shrink the batch tile (divisor-aware).
        while tb_units > 1 and _footprint(tile_b_sel, tile_n_sel) > budget:
            tb_units = _largest_divisor_leq(b_units, tb_units - 1)
            tile_b_sel = tb_units * min_b
        # TODO(synk): K-block the contraction dim for very large input_size
        # instead of relying on tile_b shrinkage alone.

    tile_b_sel = max(min_b, tile_b_sel)
    tile_n_sel = max(128, tile_n_sel)
    grid = (B_pad // tile_b_sel, N_pad // tile_n_sel)

    # --- Padding (batch to tile multiple, output to lane-dense multiple) ----
    x_p = x if B_pad == B else jnp.pad(x, ((0, B_pad - B), (0, 0)))
    if N_pad == output_size:
        Vt_p, bias_p = Vt, bias
    else:
        Vt_p = jnp.pad(Vt, ((0, 0), (0, N_pad - output_size)))
        bias_p = jnp.pad(bias, (0, N_pad - output_size))

    x_c = x_p.astype(compute_dtype)
    u_c = Ueff.astype(compute_dtype)
    v_c = Vt_p.astype(compute_dtype)
    b2 = bias_p.reshape(1, N_pad).astype(jnp.float32)

    # --- VMEM limit: raise only when needed, cap below physical VMEM --------
    fp = _footprint(tile_b_sel, tile_n_sel)
    if vmem_limit_bytes is None and fp > (8 << 20):
        cap = int(0.80 * physical_vmem)
        vmem_limit_bytes = int(min(max(int(1.5 * fp), 32 << 20), cap))

    # --- Cost hint (now consistent with the hoisted h) -----------------------
    flops = int(2 * B_pad * r_pad * (input_size + N_pad))
    bytes_accessed = int(B_pad * input_size * csize
                         + input_size * r_pad * csize
                         + r_pad * N_pad * csize
                         + N_pad * 4
                         + B_pad * N_pad * osize)
    cost = pl.CostEstimate(flops=flops, transcendentals=0,
                           bytes_accessed=bytes_accessed)

    kernel = functools.partial(_lowrank_kernel, activation=activation)
    out_n_is_single_tile = (tile_n_sel == N_pad)

    def _run(use_buffered):
        def wspec(shape, imap, is_grid_invariant):
            if use_buffered and is_grid_invariant:
                return pl.BlockSpec(shape, imap, pipeline_mode=pl.Buffered(1))
            return pl.BlockSpec(shape, imap)

        in_specs = [
            pl.BlockSpec((tile_b_sel, input_size), lambda i, j: (i, 0)),       # x
            wspec((input_size, r_pad), lambda i, j: (0, 0), True),             # U@S
            wspec((r_pad, tile_n_sel), lambda i, j: (0, j),
                  out_n_is_single_tile),                                       # V.T
            wspec((1, tile_n_sel), lambda i, j: (0, j),
                  out_n_is_single_tile),                                       # bias
        ]
        out_spec = pl.BlockSpec((tile_b_sel, tile_n_sel), lambda i, j: (i, j))

        return pl.pallas_call(
            kernel,
            out_shape=jax.ShapeDtypeStruct((B_pad, N_pad), out_dtype),
            grid_spec=pltpu.PrefetchScalarGridSpec(
                num_scalar_prefetch=0,
                grid=grid,
                in_specs=in_specs,
                out_specs=out_spec,
                scratch_shapes=[pltpu.VMEM((tile_b_sel, r_pad), jnp.float32)]),
            compiler_params=pltpu.CompilerParams(
                dimension_semantics=("parallel", "arbitrary"),
                vmem_limit_bytes=vmem_limit_bytes),
            cost_estimate=cost,
        )(x_c, u_c, v_c, b2)

    out = None
    if single_buffer_weights and hasattr(pl, "Buffered"):
        try:
            out = _run(True)
        except Exception:
            out = None   # fall back to default double-buffering below
    if out is None:
        out = _run(False)

    return out[:B, :output_size]


def init_params(key, input_size, output_size, rank, dtype=jnp.float32):
    """Deterministic init mirroring the PyTorch __init__ (QR of a random matrix)."""
    if rank > min(input_size, output_size):
        raise ValueError(
            "The rank cannot be larger than the minimum of input_size and output_size.")
    k_a, k_s, k_b = jax.random.split(key, 3)
    A = jax.random.normal(k_a, (input_size + output_size, rank), dtype=jnp.float32)
    Q, _ = jnp.linalg.qr(A, mode="reduced")
    U = Q[:input_size, :].astype(dtype)
    V = Q[input_size:, :].astype(dtype)
    S = jax.random.normal(k_s, (rank, rank), dtype=dtype)
    bias = jax.random.normal(k_b, (output_size,), dtype=dtype)
    return U, S, V, bias


def _reference(x, U, S, V, bias, activation):
    y = ((x @ U) @ S) @ V.T + bias
    return activation(y) if activation is not None else y


if __name__ == "__main__":
    key = jax.random.PRNGKey(0)
    k1, k2, k3, k4 = jax.random.split(key, 4)
    act = jax.nn.relu

    # --- Config 1: small shapes exercising batch & output padding -----------
    input_size, output_size, rank, batch = 32, 48, 8, 12
    U, S, V, bias = init_params(k1, input_size, output_size, rank)
    x = jax.random.normal(k2, (batch, input_size), dtype=jnp.float32)
    ref = _reference(x, U, S, V, bias, act)

    # f32 compute path: tight check.
    out_f32 = vanilla_low_rank_forward(x, U, S, V, bias, activation=act,
                                       compute_dtype=jnp.float32)
    out_f32 = jax.block_until_ready(out_f32)
    assert out_f32.shape == (batch, output_size)
    assert jnp.allclose(out_f32, ref, atol=1e-4, rtol=1e-4), "f32 mismatch vs reference"

    # Default (bf16-streamed, f32-accumulate) path: loose norm-based check.
    out_def = vanilla_low_rank_forward(x, U, S, V, bias, activation=act)
    out_def = jax.block_until_ready(out_def)
    assert out_def.shape == (batch, output_size)
    rel_err = jnp.linalg.norm(out_def.astype(jnp.float32) - ref) / (
        jnp.linalg.norm(ref) + 1e-6)
    assert float(rel_err) < 0.05, f"bf16 path rel err too large: {float(rel_err)}"

    # --- Config 2: force a multi-tile output axis to exercise the hoisted h --
    input_size2, output_size2, rank2, batch2 = 32, 256, 16, 24
    U2, S2, V2, bias2 = init_params(k3, input_size2, output_size2, rank2)
    x2 = jax.random.normal(k4, (batch2, input_size2), dtype=jnp.float32)
    ref2 = _reference(x2, U2, S2, V2, bias2, act)

    out2 = vanilla_low_rank_forward(x2, U2, S2, V2, bias2, activation=act,
                                    compute_dtype=jnp.float32, max_tile_n=128)
    out2 = jax.block_until_ready(out2)
    assert out2.shape == (batch2, output_size2)
    assert jnp.allclose(out2, ref2, atol=1e-4, rtol=1e-4), "multi-tile-j mismatch"

    print("KERNEL_OK")
</pallas_src>

<mosaic_0001>
module attributes {stable_mosaic.version = 11 : i64} {
  func.func @_lowrank_kernel(%arg0: i32, %arg1: i32, %arg2: memref<8x32xf32, #tpu.memory_space<vmem>>, %arg3: memref<32x128xf32, #tpu.memory_space<vmem>>, %arg4: memref<128x128xf32, #tpu.memory_space<vmem>>, %arg5: memref<1x128xf32, #tpu.memory_space<vmem>>, %arg6: memref<8x128xf32, #tpu.memory_space<vmem>>, %arg7: memref<8x128xf32, #tpu.memory_space<vmem>>) attributes {dimension_semantics = [#tpu.dimension_semantics<parallel>, #tpu.dimension_semantics<arbitrary>], iteration_bounds = array<i64: 2, 1>, scalar_prefetch = 0 : i64, scratch_operands = 1 : i64, tpu.core_type = #tpu.core_type<tc>, window_params = [{transform_indices = @transform_0, window_bounds = array<i64: 8, 32>}, {pipeline_mode = #tpu.pipeline_mode<synchronous>, transform_indices = @transform_1, window_bounds = array<i64: 32, 128>}, {pipeline_mode = #tpu.pipeline_mode<synchronous>, transform_indices = @transform_2, window_bounds = array<i64: 128, 128>}, {pipeline_mode = #tpu.pipeline_mode<synchronous>, transform_indices = @transform_3, window_bounds = array<i64: 1, 128>}, {transform_indices = @transform_4, window_bounds = array<i64: 8, 128>}]} {
    %c0_i32 = arith.constant 0 : i32
    %0 = arith.cmpi eq, %arg1, %c0_i32 : i32
    %1 = arith.extui %0 : i1 to i32
    %c0_i32_0 = arith.constant 0 : i32
    %2 = arith.cmpi ne, %1, %c0_i32_0 : i32
    scf.if %2 {
      %c0_9 = arith.constant 0 : index
      %c0_10 = arith.constant 0 : index
      %12 = vector.load %arg2[%c0_9, %c0_10] : memref<8x32xf32, #tpu.memory_space<vmem>>, vector<8x32xf32>
      %c0_11 = arith.constant 0 : index
      %c0_12 = arith.constant 0 : index
      %13 = vector.load %arg3[%c0_11, %c0_12] : memref<32x128xf32, #tpu.memory_space<vmem>>, vector<32x128xf32>
      %cst_13 = arith.constant dense<0.000000e+00> : vector<8x128xf32>
      %14 = tpu.matmul %12, %13, %cst_13 {dimension_numbers = #tpu.dot_dimension_numbers<[1], [0], [0], [1], [0, 0, 1, 1], [], []>} : vector<8x32xf32>, vector<32x128xf32>, vector<8x128xf32> -> vector<8x128xf32>
      %c0_14 = arith.constant 0 : index
      %c0_15 = arith.constant 0 : index
      %15 = vector.load %arg7[%c0_14, %c0_15] : memref<8x128xf32, #tpu.memory_space<vmem>>, vector<8x128xf32>
      tpu.vector_store %arg7[%c0_14, %c0_15], %14 {strides = array<i32>} : memref<8x128xf32, #tpu.memory_space<vmem>>, vector<8x128xf32>,
    } else {
    }
    %c0 = arith.constant 0 : index
    %c0_1 = arith.constant 0 : index
    %3 = vector.load %arg7[%c0, %c0_1] : memref<8x128xf32, #tpu.memory_space<vmem>>, vector<8x128xf32>
    %c0_2 = arith.constant 0 : index
    %c0_3 = arith.constant 0 : index
    %4 = vector.load %arg4[%c0_2, %c0_3] : memref<128x128xf32, #tpu.memory_space<vmem>>, vector<128x128xf32>
    %cst = arith.constant dense<0.000000e+00> : vector<8x128xf32>
    %5 = tpu.matmul %3, %4, %cst {dimension_numbers = #tpu.dot_dimension_numbers<[1], [0], [0], [1], [0, 0, 1, 1], [], []>} : vector<8x128xf32>, vector<128x128xf32>, vector<8x128xf32> -> vector<8x128xf32>
    %c0_4 = arith.constant 0 : index
    %c0_5 = arith.constant 0 : index
    %6 = vector.load %arg5[%c0_4, %c0_5] : memref<1x128xf32, #tpu.memory_space<vmem>>, vector<1x128xf32>
    %7 = vector.broadcast %6 : vector<1x128xf32> to vector<8x128xf32>
    %8 = arith.addf %5, %7 : vector<8x128xf32>
    %cst_6 = arith.constant 0.000000e+00 : f32
    %9 = vector.broadcast %cst_6 : f32 to vector<8x128xf32>
    %10 = arith.maximumf %8, %9 : vector<8x128xf32>
    %c0_7 = arith.constant 0 : index
    %c0_8 = arith.constant 0 : index
    %11 = vector.load %arg6[%c0_7, %c0_8] : memref<8x128xf32, #tpu.memory_space<vmem>>, vector<8x128xf32>
    tpu.vector_store %arg6[%c0_7, %c0_8], %10 {strides = array<i32>} : memref<8x128xf32, #tpu.memory_space<vmem>>, vector<8x128xf32>,
    return
  }
  func.func @transform_0(%arg0: i32, %arg1: i32) -> (i32, i32) {
    %c0_i32 = arith.constant 0 : i32
    %c0_i32_0 = arith.constant 0 : i32
    return %arg0, %c0_i32 : i32, i32
  }
  func.func @transform_1(%arg0: i32, %arg1: i32) -> (i32, i32) {
    %c0_i32 = arith.constant 0 : i32
    %c0_i32_0 = arith.constant 0 : i32
    %c0_i32_1 = arith.constant 0 : i32
    return %c0_i32, %c0_i32_0 : i32, i32
  }
  func.func @transform_2(%arg0: i32, %arg1: i32) -> (i32, i32) {
    %c0_i32 = arith.constant 0 : i32
    %c0_i32_0 = arith.constant 0 : i32
    return %c0_i32, %arg1 : i32, i32
  }
  func.func @transform_3(%arg0: i32, %arg1: i32) -> (i32, i32) {
    %c0_i32 = arith.constant 0 : i32
    %c0_i32_0 = arith.constant 0 : i32
    return %c0_i32, %arg1 : i32, i32
  }
  func.func @transform_4(%arg0: i32, %arg1: i32) -> (i32, i32) {
    %c0_i32 = arith.constant 0 : i32
    return %arg0, %arg1 : i32, i32
  }
}

module attributes {stable_mosaic.version = 11 : i64} {
  func.func @_lowrank_kernel(%arg0: i32, %arg1: i32, %arg2: memref<8x32xf32, #tpu.memory_space<vmem>>, %arg3: memref<32x128xf32, #tpu.memory_space<vmem>>, %arg4: memref<128x128xf32, #tpu.memory_space<vmem>>, %arg5: memref<1x128xf32, #tpu.memory_space<vmem>>, %arg6: memref<8x128xf32, #tpu.memory_space<vmem>>, %arg7: memref<8x128xf32, #tpu.memory_space<vmem>>) attributes {dimension_semantics = [#tpu.dimension_semantics<parallel>, #tpu.dimension_semantics<arbitrary>], iteration_bounds = array<i64: 2, 1>, scalar_prefetch = 0 : i64, scratch_operands = 1 : i64, tpu.core_type = #tpu.core_type<tc>, window_params = [{transform_indices = @transform_0, window_bounds = array<i64: 8, 32>}, {pipeline_mode = #tpu.pipeline_mode<synchronous>, transform_indices = @transform_1, window_bounds = array<i64: 32, 128>}, {transform_indices = @transform_2, window_bounds = array<i64: 128, 128>}, {transform_indices = @transform_3, window_bounds = array<i64: 1, 128>}, {transform_indices = @transform_4, window_bounds = array<i64: 8, 128>}]} {
    %c0_i32 = arith.constant 0 : i32
    %0 = arith.cmpi eq, %arg1, %c0_i32 : i32
    %1 = arith.extui %0 : i1 to i32
    %c0_i32_0 = arith.constant 0 : i32
    %2 = arith.cmpi ne, %1, %c0_i32_0 : i32
    scf.if %2 {
      %c0_9 = arith.constant 0 : index
      %c0_10 = arith.constant 0 : index
      %12 = vector.load %arg2[%c0_9, %c0_10] : memref<8x32xf32, #tpu.memory_space<vmem>>, vector<8x32xf32>
      %c0_11 = arith.constant 0 : index
      %c0_12 = arith.constant 0 : index
      %13 = vector.load %arg3[%c0_11, %c0_12] : memref<32x128xf32, #tpu.memory_space<vmem>>, vector<32x128xf32>
      %cst_13 = arith.constant dense<0.000000e+00> : vector<8x128xf32>
      %14 = tpu.matmul %12, %13, %cst_13 {dimension_numbers = #tpu.dot_dimension_numbers<[1], [0], [0], [1], [0, 0, 1, 1], [], []>} : vector<8x32xf32>, vector<32x128xf32>, vector<8x128xf32> -> vector<8x128xf32>
      %c0_14 = arith.constant 0 : index
      %c0_15 = arith.constant 0 : index
      %15 = vector.load %arg7[%c0_14, %c0_15] : memref<8x128xf32, #tpu.memory_space<vmem>>, vector<8x128xf32>
      tpu.vector_store %arg7[%c0_14, %c0_15], %14 {strides = array<i32>} : memref<8x128xf32, #tpu.memory_space<vmem>>, vector<8x128xf32>,
    } else {
    }
    %c0 = arith.constant 0 : index
    %c0_1 = arith.constant 0 : index
    %3 = vector.load %arg7[%c0, %c0_1] : memref<8x128xf32, #tpu.memory_space<vmem>>, vector<8x128xf32>
    %c0_2 = arith.constant 0 : index
    %c0_3 = arith.constant 0 : index
    %4 = vector.load %arg4[%c0_2, %c0_3] : memref<128x128xf32, #tpu.memory_space<vmem>>, vector<128x128xf32>
    %cst = arith.constant dense<0.000000e+00> : vector<8x128xf32>
    %5 = tpu.matmul %3, %4, %cst {dimension_numbers = #tpu.dot_dimension_numbers<[1], [0], [0], [1], [0, 0, 1, 1], [], []>} : vector<8x128xf32>, vector<128x128xf32>, vector<8x128xf32> -> vector<8x128xf32>
    %c0_4 = arith.constant 0 : index
    %c0_5 = arith.constant 0 : index
    %6 = vector.load %arg5[%c0_4, %c0_5] : memref<1x128xf32, #tpu.memory_space<vmem>>, vector<1x128xf32>
    %7 = vector.broadcast %6 : vector<1x128xf32> to vector<8x128xf32>
    %8 = arith.addf %5, %7 : vector<8x128xf32>
    %cst_6 = arith.constant 0.000000e+00 : f32
    %9 = vector.broadcast %cst_6 : f32 to vector<8x128xf32>
    %10 = arith.maximumf %8, %9 : vector<8x128xf32>
    %c0_7 = arith.constant 0 : index
    %c0_8 = arith.constant 0 : index
    %11 = vector.load %arg6[%c0_7, %c0_8] : memref<8x128xf32, #tpu.memory_space<vmem>>, vector<8x128xf32>
    tpu.vector_store %arg6[%c0_7, %c0_8], %10 {strides = array<i32>} : memref<8x128xf32, #tpu.memory_space<vmem>>, vector<8x128xf32>,
    return
  }
  func.func @transform_0(%arg0: i32, %arg1: i32) -> (i32, i32) {
    %c0_i32 = arith.constant 0 : i32
    %c0_i32_0 = arith.constant 0 : i32
    return %arg0, %c0_i32 : i32, i32
  }
  func.func @transform_1(%arg0: i32, %arg1: i32) -> (i32, i32) {
    %c0_i32 = arith.constant 0 : i32
    %c0_i32_0 = arith.constant 0 : i32
    %c0_i32_1 = arith.constant 0 : i32
    return %c0_i32, %c0_i32_0 : i32, i32
  }
  func.func @transform_2(%arg0: i32, %arg1: i32) -> (i32, i32) {
    %c0_i32 = arith.constant 0 : i32
    %c0_i32_0 = arith.constant 0 : i32
    return %c0_i32, %arg1 : i32, i32
  }
  func.func @transform_3(%arg0: i32, %arg1: i32) -> (i32, i32) {
    %c0_i32 = arith.constant 0 : i32
    %c0_i32_0 = arith.constant 0 : i32
    return %c0_i32, %arg1 : i32, i32
  }
  func.func @transform_4(%arg0: i32, %arg1: i32) -> (i32, i32) {
    %c0_i32 = arith.constant 0 : i32
    return %arg0, %arg1 : i32, i32
  }
}

</mosaic_0001>

<bundles_post_ra>
// kernel: tpu_custom_call.1
= control target key start
LH: loop header
LB: loop body
LE: loop exit
PB: predicated region body
PF: predicated region fallthrough
CT: control target
= control target key end

     0   :  { %9 = vsyncpa [#allocation4], 0  ;;  %s1258_s0 = inlined_call_operand.hbm [shape: f32[16,32], index: 0, kind: input, shape index: {}]   ;;  %s1259_s1 = inlined_call_operand.hbm [shape: f32[32,128], index: 1, kind: input, shape index: {}]   ;;  %s1260_s2 = inlined_call_operand.hbm [shape: f32[128,128], index: 2, kind: input, shape index: {}]   ;;  %s1261_s3 = inlined_call_operand.vmem [shape: f32[1,128], index: 3, kind: input, shape index: {}]   ;;  %s1262_s4 = inlined_call_operand.hbm [shape: f32[16,128], index: 4, kind: output, shape index: {}]  }
   0x1   :  { %11 = vsyncpa [#allocation4 + $0x1], 0 }
   0x2   :  { %12 = vsyncpa [#allocation7], 0 }
   0x3   :  { %13 = vsyncpa [#allocation5], 0 }
   0x4   :  { %15 = vsyncpa [#allocation5 + $0x1], 0  ;;  %s998_s15 = smov 0   ;;  %s1000_s16 = smov 0  }
   0x5   :  { %s1002_s17 = smov 0   ;;  %s1004_s18 = smov 0  }
   0x6   :  { %s1006_s19 = smov 0   ;;  %s1008_s20 = smov 0  }
   0x7 LB: > { %s584_s21 = sadd.s32 4294967295, %s962_s20   ;;  %s585_s22 = sadd.s32 4294967294, %s962_s20   ;;  %s962_s20 = sphi %s1008_s20, %s21_s20   ;;  %s958_s19 = sphi %s1006_s19, %s1284_s19   ;;  %s954_s18 = sphi %s1004_s18, %s1283_s18   ;;  %s950_s17 = sphi %s1002_s17, %s1282_s17   ;;  %s946_s16 = sphi %s1000_s16, %s1281_s16   ;;  %s942_s15 = sphi %s998_s15, %s1280_s15  }
   0x8   : > { %p53_p0 = scmp.ne.s32.totalorder %s946_s16, %s942_s15  ;;  %p1032_p1 = scmp.eq.s32.totalorder %s584_s21, 0 }
   0x9   : > { %p1036_p2 = scmp.eq.s32.totalorder %s584_s21, 1  ;;  %p158_p3 = scmp.eq.s32.totalorder %s585_s22, 1 }
   0xa   : > { %s1267_s23 = scalar_select %p1032_p1, 1, 0 }
   0xb   : > { %p1042_p4 = por %p1032_p1, %p53_p0  ;;  %p586_p5 = scmp.ge.s32.totalorder %s962_s20, 1 }
   0xc   : > { %p1047_p6 = por %p158_p3, %p53_p0  ;;  %p165_p7 = scmp.lt.s32.totalorder %s962_s20, 3 }
   0xd   : > { %s1269_s25 = scalar_select %p1042_p4, 1, 0 }
   0xe   : > { %s1270_s26 = scalar_select %p1047_p6, 1, 0 }
   0xf   : > { %p1052_p8 = pnand %p586_p5, %p165_p7  ;;  %s964_s28 = smov [#allocation6]  }
  0x10   : > { %s177_s29 = sshll.u32 %s964_s28, 4  ;;  %s965_s5 = smov [#allocation8]   ;;  %s1056_s29 = int_to_ptr.vmem [resolvable:$true] %s177_s29 }
  0x11   : > { %p714_p9 = pneg %p1052_p8  ;;  %s192_s6 = sshll.u32 %s965_s5, 4  ;;  %s1067_s6 = int_to_ptr.vmem [resolvable:$true] %s192_s6 }
  0x12   : > { %s790_s9 = scalar_lea.hbm %s1259_s1, 512 }
  0x13   : > { %p1063_p11 = pnand %p714_p9, %p1032_p1  ;;  %p791_p12 = scmp.ne.s32.totalorder %s1259_s1, %s790_s9 }
  0x14   : > { %p797_p5 = scmp.lt.u32.totalorder %s790_s9, %s1259_s1 }
  0x15   : > { %p792_p13 = pneg %p1063_p11 }
  0x17   : > { %p793_p0 = pnand %p792_p13, %p791_p12 }
  0x19   : > { %p794_p3 = pneg %p793_p0 }
  0x1b   : > { %p799_p7 = pnand %p797_p5, %p794_p3 }
  0x1d   : > { %802 = shalt.err (!%p799_p7)
}
  0x1e   : > { %s803_s14 = scalar_lea.vmem %s1056_s29, 512  ;;  %p811_p1 = scmp.lt.s32.totalorder %s1056_s29, %s1056_s29 }
  0x1f   : > { %p804_p9 = scmp.ne.s32.totalorder %s1056_s29, %s803_s14  ;;  %p812_p12 = scmp.lt.s32.totalorder %s803_s14, %s803_s14 }
  0x21   : > { %p806_p10 = pnand %p804_p9, %p792_p13  ;;  %p813_p0 = por %p812_p12, %p811_p1 }
  0x23   : > { %p807_p6 = pneg %p806_p10 }
  0x25   : > { %p814_p4 = pnand %p813_p0, %p807_p6 }
  0x27   : > { %817 = shalt.err (!%p814_p4)
}
  0x28   : > { %s966_s21 = smov 128   ;;  %s967_s22 = smov 8  }
  0x29   : > { %717 = dma.hbm_to_vmem [thread:$0]  (!%p1063_p11), %s1259_s1, 512, %s1056_s29, [#allocation7], %s966_s21, %s966_s21, %s967_s22  }
  0x2a   : > { %s818_s9 = scalar_lea.hbm %s1260_s2, 2048 }
  0x2b   : > { %p819_p1 = scmp.ne.s32.totalorder %s1260_s2, %s818_s9  ;;  %p825_p10 = scmp.lt.u32.totalorder %s818_s9, %s1260_s2 }
  0x2d   : > { %p821_p4 = pnand %p819_p1, %p792_p13 }
  0x2f   : > { %p822_p6 = pneg %p821_p4 }
  0x31   : > { %p827_p3 = pnand %p825_p10, %p822_p6 }
  0x33   : > { %830 = shalt.err (!%p827_p3)
}
  0x34   : > { %s831_s29 = scalar_lea.vmem %s1067_s6, 2048  ;;  %p839_p12 = scmp.lt.s32.totalorder %s1067_s6, %s1067_s6 }
  0x35   : > { %p832_p5 = scmp.ne.s32.totalorder %s1067_s6, %s831_s29  ;;  %p840_p0 = scmp.lt.s32.totalorder %s831_s29, %s831_s29 }
  0x37   : > { %p834_p7 = pnand %p832_p5, %p792_p13  ;;  %p841_p1 = por %p840_p0, %p839_p12 }
  0x39   : > { %p835_p9 = pneg %p834_p7 }
  0x3b   : > { %p842_p4 = pnand %p841_p1, %p835_p9 }
  0x3d   : > { %845 = shalt.err (!%p842_p4)
}
  0x3e   : > { %720 = dma.hbm_to_vmem [thread:$0]  (!%p1063_p11), %s1260_s2, 2048, %s1067_s6, [#allocation7], %s966_s21, %s966_s21, %s967_s22  }
  0x3f   : > { %s33_s5 = sadd.s32 1, %s958_s19  ;;  %s40_s7 = sadd.s32 1, %s950_s17 }
  0x40   : > { %p35_p13 = scmp.ge.s32.totalorder %s33_s5, 2  ;;  %p47_p6 = scmp.ne.s32.totalorder %s950_s17, %s946_s16 }
  0x41   : > { %p48_p10 = scmp.eq.s32.totalorder %s962_s20, 0  ;;  %p731_p3 = scmp.lt.s32.totalorder %s962_s20, 2 }
  0x42   : > { %s1286_s5 = smov (%p35_p13, %s33_s5), 0  ;;  %p1131_p7 = por %p1036_p2, %p47_p6 }
  0x43   : > { %p49_p5 = por %p48_p10, %p47_p6  ;;  %s37_s8 = ssub.s32 %s958_s19, %s1286_s5 }
  0x44   : > { %s1273_s30 = scalar_select %p1131_p7, 1, 0 }
  0x45   : > { %s212_s9 = sand.u32 1, %s950_s17   ;;  %p38_p9 = scmp.eq.s32.totalorder %s37_s8, 0 }
  0x46   : > { %s591_s6 = sshll.u32 %s212_s9, 3  ;;  %s592_s21 = sshll.u32 %s958_s19, 7 }
  0x47   : > { %s1140_s22 = scalar_select %p38_p9, %s950_s17, %s40_s7  }
  0x48   : > { %s1145_s12 = scalar_lea.hbm %s1258_s0, %s592_s21  ;;  %s216_s24 = scalar_lea.vmem [#allocation3], %s591_s6 }
  0x49   : > { %s223_s13 = sshll.u32 %s216_s24, 4  ;;  %p1149_p2 = pnand %p731_p3, %p49_p5  ;;  %s1153_s13 = int_to_ptr.vmem [resolvable:$true] %s223_s13 }
  0x4a   : > { %s213_s14 = scalar_lea.sflag [#allocation4], %s212_s9  ;;  %s846_s28 = scalar_lea.hbm %s1145_s12, 128 }
  0x4b   : > { %p847_p11 = scmp.ne.s32.totalorder %s1145_s12, %s846_s28  ;;  %p848_p12 = pneg %p1149_p2 }
  0x4c   : > { %s851_s6 = scalar_lea.hbm %s1258_s0, 256  ;;  %p852_p4 = scmp.lt.u32.totalorder %s1145_s12, %s1258_s0 }
  0x4d   : > { %p849_p0 = pnand %p848_p12, %p847_p11  ;;  %p853_p13 = scmp.lt.u32.totalorder %s851_s6, %s846_s28 }
  0x4e   : > { %p855_p10 = scmp.lt.u32.totalorder %s846_s28, %s1145_s12 }
  0x4f   : > { %p850_p1 = pneg %p849_p0  ;;  %p854_p6 = por %p853_p13, %p852_p4 }
  0x51   : > { %p856_p3 = por %p855_p10, %p854_p6 }
  0x53   : > { %p857_p5 = pnand %p856_p3, %p850_p1 }
  0x55   : > { %860 = shalt.err (!%p857_p5)
}
  0x56   : > { %s861_s9 = scalar_lea.vmem %s1153_s13, 128  ;;  %s968_s11 = smov [#allocation3]  }
  0x57   : > { %p862_p9 = scmp.ne.s32.totalorder %s1153_s13, %s861_s9  ;;  %s866_s24 = sshll.u32 %s968_s11, 4  ;;  %s867_s24 = int_to_ptr.vmem [resolvable:$false] %s866_s24 }
  0x58   : > { %s868_s7 = scalar_lea.vmem %s867_s24, 256  ;;  %p869_p7 = scmp.lt.s32.totalorder %s1153_s13, %s867_s24 }
  0x59   : > { %p864_p11 = pnand %p862_p9, %p848_p12  ;;  %p870_p4 = scmp.lt.s32.totalorder %s868_s7, %s861_s9 }
  0x5b   : > { %p865_p0 = pneg %p864_p11  ;;  %p871_p13 = por %p870_p4, %p869_p7 }
  0x5d   : > { %p872_p6 = pnand %p871_p13, %p865_p0 }
  0x5f   : > { %875 = shalt.err (!%p872_p6)
}
  0x60   : > { %724 = dma.hbm_to_vmem [thread:$0]  (!%p1149_p2), %s1145_s12, 128, %s1153_s13, %s213_s14  }
  0x61   : > { %232 = sbr.rel (%p1052_p8) target bundleno = 561 (0x231), region = 36  ;;  %s1183_s28 = sand.u32 (!%p1052_p8), 1, %s946_s16  }
  0x62   : > { %s594_s8 = sshll.u32 (!%p1052_p8), %s1183_s28, 3  ;;  %s235_s6 = scalar_lea.sflag (!%p1052_p8), [#allocation4], %s1183_s28 }
  0x63   : > { %s1189_s21 = scalar_lea.vmem (!%p1052_p8), [#allocation3], %s594_s8  ;;  %p1275_p7 = scmp.ne.s32.totalorder (!%p1052_p8), %s1269_s25, 0 }
  0x68   : > { %929 = dma.done.wait (%p1275_p7), %s235_s6, 128  }
  0x69   : > { %931 = vsyncadd (%p1275_p7), %s235_s6, 4294967168  ;;  %p1276_p2 = scmp.ne.s32.totalorder %s1267_s23, 0 }
  0x6b   : > { %933 = dma.done.wait (%p1276_p2), [#allocation7], 2560  }
  0x6c   : > { %935 = vsyncadd (%p1276_p2), [#allocation7], 4294964736  ;;  %v969_v0 = vmov 0.0|0.0   ;;  %vm970_vm0 = vmmov 0   ;;  %v971_v1 = vmov 0.0   ;;  %v282_v2 = vld [vmem:[#allocation6] sm:$0xff] }
  0x6d   : > { %672 = vmatprep.subr.bf16.mxu0 %v969_v0  ;;  %634 = vmatprep.mubr.msk.f32.mxu0 %vm970_vm0, %v971_v1  ;;  %v283_v3 = vld [vmem:[#allocation6 + $0x8] sm:$0xff]  ;;  %v284_v4 = vld [vmem:[#allocation6 + $0x10] sm:$0xff]  ;;  %v285_v6 = vld [vmem:[#allocation6 + $0x18] sm:$0xff]  ;;  %vm286_vm1 = vcmask 261120   ;;  %s601_s27 = sshll.u32 %s954_s18, 7  ;;  %s273_s12 = scalar_lea.vmem [#allocation9], %s594_s8 }
  0x6e   : > { %678 = vmatprep.subr.bf16.mxu1 %v969_v0  ;;  %669 = vmatprep.mubr.msk.f32.mxu1 %vm970_vm0, %v971_v1  ;;  %v673_v5 = vpack.c.bf16 %v283_v3, %v282_v2  ;;  %v362_v7 = vld [vmem:[#allocation8] sm:$0xff]  ;;  %v363_v8 = vld [vmem:[#allocation8 + $0x8] sm:$0xff]  ;;  %v364_v9 = vld [vmem:[#allocation8 + $0x10] sm:$0xff]  ;;  %v676_v11 = vpack.c.bf16 %v285_v6, %v284_v4  ;;  %s472_s13 = sshll.u32 %s273_s12, 4  ;;  %s1209_s10 = scalar_lea.hbm %s1262_s4, %s601_s27  ;;  %s1211_s13 = int_to_ptr.vmem [resolvable:$true] %s472_s13 }
  0x6f   : > { %v365_v10 = vld [vmem:[#allocation8 + $0x18] sm:$0xff]  ;;  %v679_v12 = vpack.c.bf16 %v363_v8, %v362_v7  ;;  %v366_v14 = vld [vmem:[#allocation8 + $0x20] sm:$0xff]  ;;  %v367_v15 = vld [vmem:[#allocation8 + $0x28] sm:$0xff]  ;;  %s458_s9 = scalar_lea.sflag [#allocation5], %s1183_s28  ;;  %s876_s11 = scalar_lea.vmem %s1211_s13, 128 }
  0x70   : > { %674 = vmatpush3.bf16.msra.mxu0 %v673_v5  ;;  %v682_v13 = vpack.c.bf16 %v365_v10, %v364_v9  ;;  %v281_v16 = vld [vmem:[%s1189_s21] sm:$0xff]  ;;  %v685_v17 = vpack.c.bf16 %v367_v15, %v366_v14  ;;  %v370_v21 = vld [vmem:[#allocation8 + $0x40] sm:$0xff]  ;;  %v371_v22 = vld [vmem:[#allocation8 + $0x48] sm:$0xff]  ;;  %p877_p8 = scmp.ne.s32.totalorder %s1211_s13, %s876_s11  ;;  %p1277_p12 = scmp.ne.s32.totalorder %s1273_s30, 0 }
  0x71   : > { %675 = vmatprep.subr.bf16.mxu0 %v969_v0  ;;  %680 = vmatpush3.bf16.msra.mxu1 %v679_v12  ;;  %v368_v18 = vld [vmem:[#allocation8 + $0x30] sm:$0xff]  ;;  %v369_v19 = vld [vmem:[#allocation8 + $0x38] sm:$0xff]  ;;  %v691_v23 = vpack.c.bf16 %v371_v22, %v370_v21  ;;  %v374_v27 = vld [vmem:[#allocation8 + $0x60] sm:$0xff]  ;;  %s972_s18 = smov [#allocation9]  }
  0x72   : > { %681 = vmatprep.subr.bf16.mxu1 %v969_v0  ;;  %v688_v20 = vpack.c.bf16 %v369_v19, %v368_v18  ;;  %v372_v24 = vld [vmem:[#allocation8 + $0x50] sm:$0xff]  ;;  %v373_v25 = vld [vmem:[#allocation8 + $0x58] sm:$0xff]  ;;  %v375_v28 = vld [vmem:[#allocation8 + $0x68] sm:$0xff]  ;;  %p878_p1 = pnand %p877_p8, %p1277_p12  ;;  %s880_s24 = sshll.u32 %s972_s18, 4  ;;  %s881_s24 = int_to_ptr.vmem [resolvable:$false] %s880_s24 }
  0x73   : > { %v694_v26 = vpack.c.bf16 %v373_v25, %v372_v24  ;;  %v697_v29 = vpack.c.bf16 %v375_v28, %v374_v27  ;;  %v376_v30 = vld [vmem:[#allocation8 + $0x70] sm:$0xff]  ;;  %v377_v31 = vld [vmem:[#allocation8 + $0x78] sm:$0xff]  ;;  %s882_s7 = scalar_lea.vmem %s881_s24, 256  ;;  %p883_p3 = scmp.lt.s32.totalorder %s1211_s13, %s881_s24 }
  0x74   : > { %677 = vmatpush3.bf16.msra.mxu0 %v676_v11  ;;  %v700_v32 = vpack.c.bf16 %v377_v31, %v376_v30  ;;  %v599_v35 = vld [vmem:[%s1261_s3] ss:$0 sm:$0xff]  ;;  %p879_p10 = pneg %p878_p1  ;;  %p884_p5 = scmp.lt.s32.totalorder %s882_s7, %s876_s11 }
  0x75   : > { %683 = vmatpush3.bf16.msra.mxu1 %v682_v13 }
  0x76   : > { %684 = vmatprep.subr.bf16.mxu1 %v969_v0  ;;  %p885_p9 = por %p884_p5, %p883_p3 }
  0x77   : > { %635 = vmatmul.mubr.msk.f32.vlgmr.msra.gmra.mrb[0].mxu0 %vm286_vm1, %v281_v16 }
  0x78   : > { %p886_p11 = pnand %p885_p9, %p879_p10 }
  0x79   : > { %686 = vmatpush3.bf16.msra.mxu1 %v685_v17 }
  0x7a   : > { %687 = vmatprep.subr.bf16.mxu1 %v969_v0 }
  0x7d   : > { %689 = vmatpush3.bf16.msra.mxu1 %v688_v20 }
  0x7e   : > { %690 = vmatprep.subr.bf16.mxu1 %v969_v0 }
  0x81   : > { %692 = vmatpush3.bf16.msra.mxu1 %v691_v23 }
  0x82   : > { %693 = vmatprep.subr.bf16.mxu1 %v969_v0 }
  0x85   : > { %695 = vmatpush3.bf16.msra.mxu1 %v694_v26 }
  0x86   : > { %696 = vmatprep.subr.bf16.mxu1 %v969_v0 }
  0x89   : > { %698 = vmatpush3.bf16.msra.mxu1 %v697_v29 }
  0x8a   : > { %699 = vmatprep.subr.bf16.mxu1 %v969_v0 }
  0x8d   : > { %701 = vmatpush3.bf16.msra.mxu1 %v700_v32 }
 0x14a   : > { %v356_v33 = vpop.f32.mrb[0].mxu0 }
 0x14b   : > { %v636_v34 = vpop.f32.mrb[1].mxu0  ;;  %670 = vmatmul.mubr.f32.vlgmr.msra.gmra.mrb[0].mxu1 %v356_v33 }
 0x21e   : > { %v451_v36 = vpop.f32.mrb[0].mxu1 }
 0x21f   : > { %v452_v37 = vadd.f32 %v599_v35, %v451_v36  ;;  %v671_v38 = vpop.f32.mrb[1].mxu1 }
 0x221   : > { %v455_v39 = vmax.f32 %v452_v37, 0.0 }
 0x223   : > { %456 = vst [vmem:[%s273_s12] sm:$0xff] %v455_v39 }
 0x224   : > { %889 = shalt.err (!%p886_p11)
}
 0x225   : > { %s890_s28 = scalar_lea.hbm %s1209_s10, 128  ;;  %s894_s21 = scalar_lea.hbm %s1262_s4, 256 }
 0x226   : > { %p891_p0 = scmp.ne.s32.totalorder %s1209_s10, %s890_s28  ;;  %p895_p6 = scmp.lt.u32.totalorder %s1209_s10, %s1262_s4 }
 0x227   : > { %p896_p7 = scmp.lt.u32.totalorder %s894_s21, %s890_s28  ;;  %p898_p8 = scmp.lt.u32.totalorder %s890_s28, %s1209_s10 }
 0x228   : > { %p892_p4 = pnand %p891_p0, %p1277_p12 }
 0x229   : > { %p897_p2 = por %p896_p7, %p895_p6 }
 0x22a   : > { %p893_p13 = pneg %p892_p4 }
 0x22b   : > { %p899_p1 = por %p898_p8, %p897_p2 }
 0x22d   : > { %p900_p10 = pnand %p899_p1, %p893_p13 }
 0x22f   : > { %903 = shalt.err (!%p900_p10)
}
 0x230   : > { %712 = dma.vmem_to_hbm [thread:$0]  (%p1277_p12), %s1211_s13, 128, %s1209_s10, %s458_s9  }
 0x231 PF: > { %s484_s27 = sand.u32 1, %s942_s15   ;;  %p1278_p3 = scmp.ne.s32.totalorder %s1270_s26, 0 }
 0x232   : > { %p1279_p5 = scmp.ge.s32.totalorder %s962_s20, 2  ;;  %s485_s12 = scalar_lea.sflag [#allocation5], %s484_s27 }
 0x234   : > { %p726_p9 = pnand %p1279_p5, %p1278_p3 }
 0x236   : > { %937 = dma.done.wait (!%p726_p9), %s485_s12, 128  }
 0x237   : > { %939 = vsyncadd (!%p726_p9), %s485_s12, 4294967168  ;;  %s21_s20 = sadd.s32 1, %s962_s20   ;;  %s1280_s15 = smov %s946_s16 }
 0x238   : > { %p18_p11 = scmp.ge.s32.totalorder %s21_s20, 4   ;;  %s1281_s16 = smov %s950_s17 }
 0x239   : > { %s1282_s17 = smov %s1140_s22  ;;  %s1283_s18 = smov %s958_s19 }
 0x23a   : > { %s1284_s19 = smov %s1286_s5  ;;  %20 = sbr.rel (!%p18_p11) target bundleno = 7 (0x7), region = 97 }
 0x241   :  { %490 = vsyncpa [#allocation4], 1 }
 0x242   :  { %492 = vsyncpa [#allocation4 + $0x1], 1 }
 0x243   :  { %493 = vsyncpa [#allocation7], 1 }
 0x244   :  { %494 = vsyncpa [#allocation5], 1 }
 0x245   :  { %496 = vsyncpa [#allocation5 + $0x1], 1 }

// kernel: tpu_custom_call.1
= control target key start
LH: loop header
LB: loop body
LE: loop exit
PB: predicated region body
PF: predicated region fallthrough
CT: control target
= control target key end

     0   :  { %9 = vsyncpa [#allocation4], 0  ;;  %s1258_s0 = inlined_call_operand.hbm [shape: f32[16,32], index: 0, kind: input, shape index: {}]   ;;  %s1259_s1 = inlined_call_operand.hbm [shape: f32[32,128], index: 1, kind: input, shape index: {}]   ;;  %s1260_s2 = inlined_call_operand.hbm [shape: f32[128,128], index: 2, kind: input, shape index: {}]   ;;  %s1261_s3 = inlined_call_operand.vmem [shape: f32[1,128], index: 3, kind: input, shape index: {}]   ;;  %s1262_s4 = inlined_call_operand.hbm [shape: f32[16,128], index: 4, kind: output, shape index: {}]  }
   0x1   :  { %11 = vsyncpa [#allocation4 + $0x1], 0 }
   0x2   :  { %12 = vsyncpa [#allocation7], 0 }
   0x3   :  { %13 = vsyncpa [#allocation5], 0 }
   0x4   :  { %15 = vsyncpa [#allocation5 + $0x1], 0  ;;  %s998_s15 = smov 0   ;;  %s1000_s16 = smov 0  }
   0x5   :  { %s1002_s17 = smov 0   ;;  %s1004_s18 = smov 0  }
   0x6   :  { %s1006_s19 = smov 0   ;;  %s1008_s20 = smov 0  }
   0x7 LB: > { %s584_s21 = sadd.s32 4294967295, %s962_s20   ;;  %s585_s22 = sadd.s32 4294967294, %s962_s20   ;;  %s962_s20 = sphi %s1008_s20, %s21_s20   ;;  %s958_s19 = sphi %s1006_s19, %s1284_s19   ;;  %s954_s18 = sphi %s1004_s18, %s1283_s18   ;;  %s950_s17 = sphi %s1002_s17, %s1282_s17   ;;  %s946_s16 = sphi %s1000_s16, %s1281_s16   ;;  %s942_s15 = sphi %s998_s15, %s1280_s15  }
   0x8   : > { %p53_p0 = scmp.ne.s32.totalorder %s946_s16, %s942_s15  ;;  %p1032_p1 = scmp.eq.s32.totalorder %s584_s21, 0 }
   0x9   : > { %p1036_p2 = scmp.eq.s32.totalorder %s584_s21, 1  ;;  %p158_p3 = scmp.eq.s32.totalorder %s585_s22, 1 }
   0xa   : > { %s1267_s23 = scalar_select %p1032_p1, 1, 0 }
   0xb   : > { %p1042_p4 = por %p1032_p1, %p53_p0  ;;  %p586_p5 = scmp.ge.s32.totalorder %s962_s20, 1 }
   0xc   : > { %p1047_p6 = por %p158_p3, %p53_p0  ;;  %p165_p7 = scmp.lt.s32.totalorder %s962_s20, 3 }
   0xd   : > { %s1269_s25 = scalar_select %p1042_p4, 1, 0 }
   0xe   : > { %s1270_s26 = scalar_select %p1047_p6, 1, 0 }
   0xf   : > { %p1052_p8 = pnand %p586_p5, %p165_p7  ;;  %s964_s28 = smov [#allocation6]  }
  0x10   : > { %s177_s29 = sshll.u32 %s964_s28, 4  ;;  %s965_s5 = smov [#allocation8]   ;;  %s1056_s29 = int_to_ptr.vmem [resolvable:$true] %s177_s29 }
  0x11   : > { %p714_p9 = pneg %p1052_p8  ;;  %s192_s6 = sshll.u32 %s965_s5, 4  ;;  %s1067_s6 = int_to_ptr.vmem [resolvable:$true] %s192_s6 }
  0x12   : > { %s790_s9 = scalar_lea.hbm %s1259_s1, 512 }
  0x13   : > { %p1063_p11 = pnand %p714_p9, %p1032_p1  ;;  %p791_p12 = scmp.ne.s32.totalorder %s1259_s1, %s790_s9 }
  0x14   : > { %p797_p5 = scmp.lt.u32.totalorder %s790_s9, %s1259_s1 }
  0x15   : > { %p792_p13 = pneg %p1063_p11 }
  0x17   : > { %p793_p0 = pnand %p792_p13, %p791_p12 }
  0x19   : > { %p794_p3 = pneg %p793_p0 }
  0x1b   : > { %p799_p7 = pnand %p797_p5, %p794_p3 }
  0x1d   : > { %802 = shalt.err (!%p799_p7)
}
  0x1e   : > { %s803_s14 = scalar_lea.vmem %s1056_s29, 512  ;;  %p811_p1 = scmp.lt.s32.totalorder %s1056_s29, %s1056_s29 }
  0x1f   : > { %p804_p9 = scmp.ne.s32.totalorder %s1056_s29, %s803_s14  ;;  %p812_p12 = scmp.lt.s32.totalorder %s803_s14, %s803_s14 }
  0x21   : > { %p806_p10 = pnand %p804_p9, %p792_p13  ;;  %p813_p0 = por %p812_p12, %p811_p1 }
  0x23   : > { %p807_p6 = pneg %p806_p10 }
  0x25   : > { %p814_p4 = pnand %p813_p0, %p807_p6 }
  0x27   : > { %817 = shalt.err (!%p814_p4)
}
  0x28   : > { %s966_s21 = smov 128   ;;  %s967_s22 = smov 8  }
  0x29   : > { %717 = dma.hbm_to_vmem [thread:$0]  (!%p1063_p11), %s1259_s1, 512, %s1056_s29, [#allocation7], %s966_s21, %s966_s21, %s967_s22  }
  0x2a   : > { %s818_s9 = scalar_lea.hbm %s1260_s2, 2048 }
  0x2b   : > { %p819_p1 = scmp.ne.s32.totalorder %s1260_s2, %s818_s9  ;;  %p825_p10 = scmp.lt.u32.totalorder %s818_s9, %s1260_s2 }
  0x2d   : > { %p821_p4 = pnand %p819_p1, %p792_p13 }
  0x2f   : > { %p822_p6 = pneg %p821_p4 }
  0x31   : > { %p827_p3 = pnand %p825_p10, %p822_p6 }
  0x33   : > { %830 = shalt.err (!%p827_p3)
}
  0x34   : > { %s831_s29 = scalar_lea.vmem %s1067_s6, 2048  ;;  %p839_p12 = scmp.lt.s32.totalorder %s1067_s6, %s1067_s6 }
  0x35   : > { %p832_p5 = scmp.ne.s32.totalorder %s1067_s6, %s831_s29  ;;  %p840_p0 = scmp.lt.s32.totalorder %s831_s29, %s831_s29 }
  0x37   : > { %p834_p7 = pnand %p832_p5, %p792_p13  ;;  %p841_p1 = por %p840_p0, %p839_p12 }
  0x39   : > { %p835_p9 = pneg %p834_p7 }
  0x3b   : > { %p842_p4 = pnand %p841_p1, %p835_p9 }
  0x3d   : > { %845 = shalt.err (!%p842_p4)
}
  0x3e   : > { %720 = dma.hbm_to_vmem [thread:$0]  (!%p1063_p11), %s1260_s2, 2048, %s1067_s6, [#allocation7], %s966_s21, %s966_s21, %s967_s22  }
  0x3f   : > { %s33_s5 = sadd.s32 1, %s958_s19  ;;  %s40_s7 = sadd.s32 1, %s950_s17 }
  0x40   : > { %p35_p13 = scmp.ge.s32.totalorder %s33_s5, 2  ;;  %p47_p6 = scmp.ne.s32.totalorder %s950_s17, %s946_s16 }
  0x41   : > { %p48_p10 = scmp.eq.s32.totalorder %s962_s20, 0  ;;  %p731_p3 = scmp.lt.s32.totalorder %s962_s20, 2 }
  0x42   : > { %s1286_s5 = smov (%p35_p13, %s33_s5), 0  ;;  %p1131_p7 = por %p1036_p2, %p47_p6 }
  0x43   : > { %p49_p5 = por %p48_p10, %p47_p6  ;;  %s37_s8 = ssub.s32 %s958_s19, %s1286_s5 }
  0x44   : > { %s1273_s30 = scalar_select %p1131_p7, 1, 0 }
  0x45   : > { %s212_s9 = sand.u32 1, %s950_s17   ;;  %p38_p9 = scmp.eq.s32.totalorder %s37_s8, 0 }
  0x46   : > { %s591_s6 = sshll.u32 %s212_s9, 3  ;;  %s592_s21 = sshll.u32 %s958_s19, 7 }
  0x47   : > { %s1140_s22 = scalar_select %p38_p9, %s950_s17, %s40_s7  }
  0x48   : > { %s1145_s12 = scalar_lea.hbm %s1258_s0, %s592_s21  ;;  %s216_s24 = scalar_lea.vmem [#allocation3], %s591_s6 }
  0x49   : > { %s223_s13 = sshll.u32 %s216_s24, 4  ;;  %p1149_p2 = pnand %p731_p3, %p49_p5  ;;  %s1153_s13 = int_to_ptr.vmem [resolvable:$true] %s223_s13 }
  0x4a   : > { %s213_s14 = scalar_lea.sflag [#allocation4], %s212_s9  ;;  %s846_s28 = scalar_lea.hbm %s1145_s12, 128 }
  0x4b   : > { %p847_p11 = scmp.ne.s32.totalorder %s1145_s12, %s846_s28  ;;  %p848_p12 = pneg %p1149_p2 }
  0x4c   : > { %s851_s6 = scalar_lea.hbm %s1258_s0, 256  ;;  %p852_p4 = scmp.lt.u32.totalorder %s1145_s12, %s1258_s0 }
  0x4d   : > { %p849_p0 = pnand %p848_p12, %p847_p11  ;;  %p853_p13 = scmp.lt.u32.totalorder %s851_s6, %s846_s28 }
  0x4e   : > { %p855_p10 = scmp.lt.u32.totalorder %s846_s28, %s1145_s12 }
  0x4f   : > { %p850_p1 = pneg %p849_p0  ;;  %p854_p6 = por %p853_p13, %p852_p4 }
  0x51   : > { %p856_p3 = por %p855_p10, %p854_p6 }
  0x53   : > { %p857_p5 = pnand %p856_p3, %p850_p1 }
  0x55   : > { %860 = shalt.err (!%p857_p5)
}
  0x56   : > { %s861_s9 = scalar_lea.vmem %s1153_s13, 128  ;;  %s968_s11 = smov [#allocation3]  }
  0x57   : > { %p862_p9 = scmp.ne.s32.totalorder %s1153_s13, %s861_s9  ;;  %s866_s24 = sshll.u32 %s968_s11, 4  ;;  %s867_s24 = int_to_ptr.vmem [resolvable:$false] %s866_s24 }
  0x58   : > { %s868_s7 = scalar_lea.vmem %s867_s24, 256  ;;  %p869_p7 = scmp.lt.s32.totalorder %s1153_s13, %s867_s24 }
  0x59   : > { %p864_p11 = pnand %p862_p9, %p848_p12  ;;  %p870_p4 = scmp.lt.s32.totalorder %s868_s7, %s861_s9 }
  0x5b   : > { %p865_p0 = pneg %p864_p11  ;;  %p871_p13 = por %p870_p4, %p869_p7 }
  0x5d   : > { %p872_p6 = pnand %p871_p13, %p865_p0 }
  0x5f   : > { %875 = shalt.err (!%p872_p6)
}
  0x60   : > { %724 = dma.hbm_to_vmem [thread:$0]  (!%p1149_p2), %s1145_s12, 128, %s1153_s13, %s213_s14  }
  0x61   : > { %232 = sbr.rel (%p1052_p8) target bundleno = 561 (0x231), region = 36  ;;  %s1183_s28 = sand.u32 (!%p1052_p8), 1, %s946_s16  }
  0x62   : > { %s594_s8 = sshll.u32 (!%p1052_p8), %s1183_s28, 3  ;;  %s235_s6 = scalar_lea.sflag (!%p1052_p8), [#allocation4], %s1183_s28 }
  0x63   : > { %s1189_s21 = scalar_lea.vmem (!%p1052_p8), [#allocation3], %s594_s8  ;;  %p1275_p7 = scmp.ne.s32.totalorder (!%p1052_p8), %s1269_s25, 0 }
  0x68   : > { %929 = dma.done.wait (%p1275_p7), %s235_s6, 128  }
  0x69   : > { %931 = vsyncadd (%p1275_p7), %s235_s6, 4294967168  ;;  %p1276_p2 = scmp.ne.s32.totalorder %s1267_s23, 0 }
  0x6b   : > { %933 = dma.done.wait (%p1276_p2), [#allocation7], 2560  }
  0x6c   : > { %935 = vsyncadd (%p1276_p2), [#allocation7], 4294964736  ;;  %v969_v0 = vmov 0.0|0.0   ;;  %vm970_vm0 = vmmov 0   ;;  %v971_v1 = vmov 0.0   ;;  %v282_v2 = vld [vmem:[#allocation6] sm:$0xff] }
  0x6d   : > { %672 = vmatprep.subr.bf16.mxu0 %v969_v0  ;;  %634 = vmatprep.mubr.msk.f32.mxu0 %vm970_vm0, %v971_v1  ;;  %v283_v3 = vld [vmem:[#allocation6 + $0x8] sm:$0xff]  ;;  %v284_v4 = vld [vmem:[#allocation6 + $0x10] sm:$0xff]  ;;  %v285_v6 = vld [vmem:[#allocation6 + $0x18] sm:$0xff]  ;;  %vm286_vm1 = vcmask 261120   ;;  %s601_s27 = sshll.u32 %s954_s18, 7  ;;  %s273_s12 = scalar_lea.vmem [#allocation9], %s594_s8 }
  0x6e   : > { %678 = vmatprep.subr.bf16.mxu1 %v969_v0  ;;  %669 = vmatprep.mubr.msk.f32.mxu1 %vm970_vm0, %v971_v1  ;;  %v673_v5 = vpack.c.bf16 %v283_v3, %v282_v2  ;;  %v362_v7 = vld [vmem:[#allocation8] sm:$0xff]  ;;  %v363_v8 = vld [vmem:[#allocation8 + $0x8] sm:$0xff]  ;;  %v364_v9 = vld [vmem:[#allocation8 + $0x10] sm:$0xff]  ;;  %v676_v11 = vpack.c.bf16 %v285_v6, %v284_v4  ;;  %s472_s13 = sshll.u32 %s273_s12, 4  ;;  %s1209_s10 = scalar_lea.hbm %s1262_s4, %s601_s27  ;;  %s1211_s13 = int_to_ptr.vmem [resolvable:$true] %s472_s13 }
  0x6f   : > { %v365_v10 = vld [vmem:[#allocation8 + $0x18] sm:$0xff]  ;;  %v679_v12 = vpack.c.bf16 %v363_v8, %v362_v7  ;;  %v366_v14 = vld [vmem:[#allocation8 + $0x20] sm:$0xff]  ;;  %v367_v15 = vld [vmem:[#allocation8 + $0x28] sm:$0xff]  ;;  %s458_s9 = scalar_lea.sflag [#allocation5], %s1183_s28  ;;  %s876_s11 = scalar_lea.vmem %s1211_s13, 128 }
  0x70   : > { %674 = vmatpush3.bf16.msra.mxu0 %v673_v5  ;;  %v682_v13 = vpack.c.bf16 %v365_v10, %v364_v9  ;;  %v281_v16 = vld [vmem:[%s1189_s21] sm:$0xff]  ;;  %v685_v17 = vpack.c.bf16 %v367_v15, %v366_v14  ;;  %v370_v21 = vld [vmem:[#allocation8 + $0x40] sm:$0xff]  ;;  %v371_v22 = vld [vmem:[#allocation8 + $0x48] sm:$0xff]  ;;  %p877_p8 = scmp.ne.s32.totalorder %s1211_s13, %s876_s11  ;;  %p1277_p12 = scmp.ne.s32.totalorder %s1273_s30, 0 }
  0x71   : > { %675 = vmatprep.subr.bf16.mxu0 %v969_v0  ;;  %680 = vmatpush3.bf16.msra.mxu1 %v679_v12  ;;  %v368_v18 = vld [vmem:[#allocation8 + $0x30] sm:$0xff]  ;;  %v369_v19 = vld [vmem:[#allocation8 + $0x38] sm:$0xff]  ;;  %v691_v23 = vpack.c.bf16 %v371_v22, %v370_v21  ;;  %v374_v27 = vld [vmem:[#allocation8 + $0x60] sm:$0xff]  ;;  %s972_s18 = smov [#allocation9]  }
  0x72   : > { %681 = vmatprep.subr.bf16.mxu1 %v969_v0  ;;  %v688_v20 = vpack.c.bf16 %v369_v19, %v368_v18  ;;  %v372_v24 = vld [vmem:[#allocation8 + $0x50] sm:$0xff]  ;;  %v373_v25 = vld [vmem:[#allocation8 + $0x58] sm:$0xff]  ;;  %v375_v28 = vld [vmem:[#allocation8 + $0x68] sm:$0xff]  ;;  %p878_p1 = pnand %p877_p8, %p1277_p12  ;;  %s880_s24 = sshll.u32 %s972_s18, 4  ;;  %s881_s24 = int_to_ptr.vmem [resolvable:$false] %s880_s24 }
  0x73   : > { %v694_v26 = vpack.c.bf16 %v373_v25, %v372_v24  ;;  %v697_v29 = vpack.c.bf16 %v375_v28, %v374_v27  ;;  %v376_v30 = vld [vmem:[#allocation8 + $0x70] sm:$0xff]  ;;  %v377_v31 = vld [vmem:[#allocation8 + $0x78] sm:$0xff]  ;;  %s882_s7 = scalar_lea.vmem %s881_s24, 256  ;;  %p883_p3 = scmp.lt.s32.totalorder %s1211_s13, %s881_s24 }
  0x74   : > { %677 = vmatpush3.bf16.msra.mxu0 %v676_v11  ;;  %v700_v32 = vpack.c.bf16 %v377_v31, %v376_v30  ;;  %v599_v35 = vld [vmem:[%s1261_s3] ss:$0 sm:$0xff]  ;;  %p879_p10 = pneg %p878_p1  ;;  %p884_p5 = scmp.lt.s32.totalorder %s882_s7, %s876_s11 }
  0x75   : > { %683 = vmatpush3.bf16.msra.mxu1 %v682_v13 }
  0x76   : > { %684 = vmatprep.subr.bf16.mxu1 %v969_v0  ;;  %p885_p9 = por %p884_p5, %p883_p3 }
  0x77   : > { %635 = vmatmul.mubr.msk.f32.vlgmr.msra.gmra.mrb[0].mxu0 %vm286_vm1, %v281_v16 }
  0x78   : > { %p886_p11 = pnand %p885_p9, %p879_p10 }
  0x79   : > { %686 = vmatpush3.bf16.msra.mxu1 %v685_v17 }
  0x7a   : > { %687 = vmatprep.subr.bf16.mxu1 %v969_v0 }
  0x7d   : > { %689 = vmatpush3.bf16.msra.mxu1 %v688_v20 }
  0x7e   : > { %690 = vmatprep.subr.bf16.mxu1 %v969_v0 }
  0x81   : > { %692 = vmatpush3.bf16.msra.mxu1 %v691_v23 }
  0x82   : > { %693 = vmatprep.subr.bf16.mxu1 %v969_v0 }
  0x85   : > { %695 = vmatpush3.bf16.msra.mxu1 %v694_v26 }
  0x86   : > { %696 = vmatprep.subr.bf16.mxu1 %v969_v0 }
  0x89   : > { %698 = vmatpush3.bf16.msra.mxu1 %v697_v29 }
  0x8a   : > { %699 = vmatprep.subr.bf16.mxu1 %v969_v0 }
  0x8d   : > { %701 = vmatpush3.bf16.msra.mxu1 %v700_v32 }
 0x14a   : > { %v356_v33 = vpop.f32.mrb[0].mxu0 }
 0x14b   : > { %v636_v34 = vpop.f32.mrb[1].mxu0  ;;  %670 = vmatmul.mubr.f32.vlgmr.msra.gmra.mrb[0].mxu1 %v356_v33 }
 0x21e   : > { %v451_v36 = vpop.f32.mrb[0].mxu1 }
 0x21f   : > { %v452_v37 = vadd.f32 %v599_v35, %v451_v36  ;;  %v671_v38 = vpop.f32.mrb[1].mxu1 }
 0x221   : > { %v455_v39 = vmax.f32 %v452_v37, 0.0 }
 0x223   : > { %456 = vst [vmem:[%s273_s12] sm:$0xff] %v455_v39 }
 0x224   : > { %889 = shalt.err (!%p886_p11)
}
 0x225   : > { %s890_s28 = scalar_lea.hbm %s1209_s10, 128  ;;  %s894_s21 = scalar_lea.hbm %s1262_s4, 256 }
 0x226   : > { %p891_p0 = scmp.ne.s32.totalorder %s1209_s10, %s890_s28  ;;  %p895_p6 = scmp.lt.u32.totalorder %s1209_s10, %s1262_s4 }
 0x227   : > { %p896_p7 = scmp.lt.u32.totalorder %s894_s21, %s890_s28  ;;  %p898_p8 = scmp.lt.u32.totalorder %s890_s28, %s1209_s10 }
 0x228   : > { %p892_p4 = pnand %p891_p0, %p1277_p12 }
 0x229   : > { %p897_p2 = por %p896_p7, %p895_p6 }
 0x22a   : > { %p893_p13 = pneg %p892_p4 }
 0x22b   : > { %p899_p1 = por %p898_p8, %p897_p2 }
 0x22d   : > { %p900_p10 = pnand %p899_p1, %p893_p13 }
 0x22f   : > { %903 = shalt.err (!%p900_p10)
}
 0x230   : > { %712 = dma.vmem_to_hbm [thread:$0]  (%p1277_p12), %s1211_s13, 128, %s1209_s10, %s458_s9  }
 0x231 PF: > { %s484_s27 = sand.u32 1, %s942_s15   ;;  %p1278_p3 = scmp.ne.s32.totalorder %s1270_s26, 0 }
 0x232   : > { %p1279_p5 = scmp.ge.s32.totalorder %s962_s20, 2  ;;  %s485_s12 = scalar_lea.sflag [#allocation5], %s484_s27 }
 0x234   : > { %p726_p9 = pnand %p1279_p5, %p1278_p3 }
 0x236   : > { %937 = dma.done.wait (!%p726_p9), %s485_s12, 128  }
 0x237   : > { %939 = vsyncadd (!%p726_p9), %s485_s12, 4294967168  ;;  %s21_s20 = sadd.s32 1, %s962_s20   ;;  %s1280_s15 = smov %s946_s16 }
 0x238   : > { %p18_p11 = scmp.ge.s32.totalorder %s21_s20, 4   ;;  %s1281_s16 = smov %s950_s17 }
 0x239   : > { %s1282_s17 = smov %s1140_s22  ;;  %s1283_s18 = smov %s958_s19 }
 0x23a   : > { %s1284_s19 = smov %s1286_s5  ;;  %20 = sbr.rel (!%p18_p11) target bundleno = 7 (0x7), region = 97 }
 0x241   :  { %490 = vsyncpa [#allocation4], 1 }
 0x242   :  { %492 = vsyncpa [#allocation4 + $0x1], 1 }
 0x243   :  { %493 = vsyncpa [#allocation7], 1 }
 0x244   :  { %494 = vsyncpa [#allocation5], 1 }
 0x245   :  { %496 = vsyncpa [#allocation5 + $0x1], 1 }

</bundles_post_ra>
